<compile_context>
chip_gen: v6e
topology: v6e:2x2x1
jax: 0.10.0
libtpu: 0.0.40
codegen_flags: <defaults>
</compile_context>

<pallas_src>
import jax
import jax.numpy as jnp
from jax.experimental import pallas as pl
from jax.experimental.pallas import tpu as pltpu


_TARGET_TILE_BYTES = 2 * 1024 * 1024  # per input tile (Pallas double-buffers it)


def _round_up(a: int, b: int) -> int:
    return ((a + b - 1) // b) * b


def _packed_matmul_kernel(x_ref, e_ref, o_ref):
    # x_ref: (tm, L)  packed node tile, L = k*E lanes (k nodes per row)
    # e_ref: (L, k)   block-diagonal atomic-energies matrix (f32, resident)
    # o_ref: (tm, k)  per-node energies
    o_ref[...] = jnp.dot(
        x_ref[...].astype(jnp.float32),
        e_ref[...],
        preferred_element_type=jnp.float32,
    ).astype(o_ref.dtype)


def _rowsum_kernel(x_ref, e_ref, o_ref):
    # Fallback when E does not divide 128.
    # x_ref: (tm, E); e_ref: (1, E); o_ref: (tm, 1)
    prod = x_ref[...].astype(jnp.float32) * e_ref[...]
    o_ref[...] = jnp.sum(prod, axis=-1, keepdims=True).astype(o_ref.dtype)


def atomic_energies_block(
    x: jax.Array,
    atomic_energies: jax.Array,
    *,
    block_rows: int = 4096,
) -> jax.Array:
    """Pallas equivalent of AtomicEnergiesBlock.forward: matmul(x, atomic_energies)."""
    assert atomic_energies.ndim == 1
    E = atomic_energies.shape[0]
    assert E >= 1
    assert x.shape[-1] == E
    assert block_rows % 8 == 0

    out_dtype = jnp.result_type(x.dtype, atomic_energies.dtype)
    lead_shape = x.shape[:-1]
    x2 = x.reshape(-1, E)
    N = x2.shape[0]
    if N == 0:
        return jnp.zeros(lead_shape, out_dtype)

    ae32 = atomic_energies.astype(jnp.float32)

    # ---- lane packing factor --------------------------------------------------
    if E <= 128 and 128 % E == 0:
        k = 128 // E          # nodes packed per row -> 128-lane-dense x tiles
    else:
        k = 1                 # VPU row-sum fallback (still dense HBM DMA)
    L = k * E

    # ---- tiling / padding -------------------------------------------------------
    M0 = -(-N // k)                                        # packed rows needed
    itemsize = jnp.dtype(x2.dtype).itemsize
    rows_cap = max(8, (_TARGET_TILE_BYTES // (L * itemsize)) // 8 * 8)
    tm = max(8, min(block_rows, rows_cap, _round_up(M0, 8)))
    M = _round_up(M0, tm)                                  # padded packed rows
    n_pad = M * k
    if n_pad != N:
        x2 = jnp.pad(x2, ((0, n_pad - N), (0, 0)))         # zero rows -> zero energy
    x_packed = x2.reshape(M, L)                            # free row-major view

    # ---- energies operand -------------------------------------------------------
    if k > 1:
        kernel = _packed_matmul_kernel
        # e_mat[j*E + e, j] = ae[e]; zeros elsewhere (block-diagonal).
        e_in = (
            jnp.eye(k, dtype=jnp.float32)[:, None, :] * ae32[None, :, None]
        ).reshape(L, k)
        e_spec = pl.BlockSpec((L, k), lambda i: (0, 0))    # resident across grid
    else:
        kernel = _rowsum_kernel
        e_in = ae32.reshape(1, E)
        e_spec = pl.BlockSpec((1, E), lambda i: (0, 0))    # resident across grid

    out = pl.pallas_call(
        kernel,
        out_shape=jax.ShapeDtypeStruct((M, k), out_dtype),
        grid_spec=pltpu.PrefetchScalarGridSpec(
            num_scalar_prefetch=0,
            grid=(M // tm,),
            in_specs=[
                pl.BlockSpec((tm, L), lambda i: (i, 0)),   # streaming node tile
                e_spec,
            ],
            out_specs=pl.BlockSpec((tm, k), lambda i: (i, 0)),
        ),
        compiler_params=pltpu.CompilerParams(
            dimension_semantics=("parallel",),             # megacore-shardable
        ),
    )(x_packed, e_in)

    return out.reshape(M * k)[:N].reshape(lead_shape)


if __name__ == "__main__":
    key = jax.random.PRNGKey(0)
    k1, k2, k3, k4 = jax.random.split(key, 4)

    # Case 1: E divides 128 (lane-packed MXU path), tile-aligned node count.
    E = 8
    atomic_energies = jnp.linspace(-5.0, 3.0, E, dtype=jnp.float32)
    x = jax.random.uniform(k1, (64, E), dtype=jnp.float32)
    out = jax.block_until_ready(atomic_energies_block(x, atomic_energies))
    ref = jnp.matmul(x, atomic_energies)
    assert out.shape == (64,)
    assert out.dtype == jnp.float32
    assert jnp.allclose(out, ref, atol=1e-5, rtol=1e-5)

    # Case 2: node count not divisible by packing factor / tile (padding path).
    x2 = jax.random.uniform(k2, (100, E), dtype=jnp.float32)
    out2 = jax.block_until_ready(atomic_energies_block(x2, atomic_energies))
    assert out2.shape == (100,)
    assert jnp.allclose(out2, jnp.matmul(x2, atomic_energies), atol=1e-5, rtol=1e-5)

    # Case 3: E does not divide 128 -> VPU row-sum fallback path.
    E3 = 10
    ae3 = jnp.linspace(-2.0, 2.0, E3, dtype=jnp.float32)
    x3 = jax.random.uniform(k3, (37, E3), dtype=jnp.float32)
    out3 = jax.block_until_ready(atomic_energies_block(x3, ae3))
    assert out3.shape == (37,)
    assert jnp.allclose(out3, jnp.matmul(x3, ae3), atol=1e-5, rtol=1e-5)

    # Case 4: arbitrary leading batch dims, like torch.matmul broadcasting.
    x4 = jax.random.uniform(k4, (2, 16, E), dtype=jnp.float32)
    out4 = jax.block_until_ready(atomic_energies_block(x4, atomic_energies))
    assert out4.shape == (2, 16)
    assert jnp.allclose(out4, jnp.matmul(x4, atomic_energies), atol=1e-5, rtol=1e-5)

    print("KERNEL_OK")
</pallas_src>

<mosaic_0001>
module attributes {stable_mosaic.version = 11 : i64} {
  func.func @_packed_matmul_kernel(%arg0: i32, %arg1: memref<8x128xf32, #tpu.memory_space<vmem>>, %arg2: memref<128x16xf32, #tpu.memory_space<vmem>>, %arg3: memref<8x16xf32, #tpu.memory_space<vmem>>) attributes {dimension_semantics = [#tpu.dimension_semantics<parallel>], iteration_bounds = array<i64: 1>, scalar_prefetch = 0 : i64, scratch_operands = 0 : i64, tpu.core_type = #tpu.core_type<tc>, window_params = [{transform_indices = @transform_0, window_bounds = array<i64: 8, 128>}, {pipeline_mode = #tpu.pipeline_mode<synchronous>, transform_indices = @transform_1, window_bounds = array<i64: 128, 16>}, {transform_indices = @transform_2, window_bounds = array<i64: 8, 16>}]} {
    %c0 = arith.constant 0 : index
    %c0_0 = arith.constant 0 : index
    %0 = vector.load %arg1[%c0, %c0_0] : memref<8x128xf32, #tpu.memory_space<vmem>>, vector<8x128xf32>
    %c0_1 = arith.constant 0 : index
    %c0_2 = arith.constant 0 : index
    %1 = vector.load %arg2[%c0_1, %c0_2] : memref<128x16xf32, #tpu.memory_space<vmem>>, vector<128x16xf32>
    %cst = arith.constant dense<0.000000e+00> : vector<8x16xf32>
    %2 = tpu.matmul %0, %1, %cst {dimension_numbers = #tpu.dot_dimension_numbers<[1], [0], [0], [1], [0, 0, 1, 1], [], []>} : vector<8x128xf32>, vector<128x16xf32>, vector<8x16xf32> -> vector<8x16xf32>
    %c0_3 = arith.constant 0 : index
    %c0_4 = arith.constant 0 : index
    %3 = vector.load %arg3[%c0_3, %c0_4] : memref<8x16xf32, #tpu.memory_space<vmem>>, vector<8x16xf32>
    tpu.vector_store %arg3[%c0_3, %c0_4], %2 {strides = array<i32>} : memref<8x16xf32, #tpu.memory_space<vmem>>, vector<8x16xf32>,
    return
  }
  func.func @transform_0(%arg0: i32) -> (i32, i32) {
    %c0_i32 = arith.constant 0 : i32
    %c0_i32_0 = arith.constant 0 : i32
    return %arg0, %c0_i32 : i32, i32
  }
  func.func @transform_1(%arg0: i32) -> (i32, i32) {
    %c0_i32 = arith.constant 0 : i32
    %c0_i32_0 = arith.constant 0 : i32
    %c0_i32_1 = arith.constant 0 : i32
    return %c0_i32, %c0_i32_0 : i32, i32
  }
  func.func @transform_2(%arg0: i32) -> (i32, i32) {
    %c0_i32 = arith.constant 0 : i32
    %c0_i32_0 = arith.constant 0 : i32
    return %arg0, %c0_i32 : i32, i32
  }
}

</mosaic_0001>

<bundles_post_ra>
// kernel: tpu_custom_call.1
= control target key start
LH: loop header
LB: loop body
LE: loop exit
PB: predicated region body
PF: predicated region fallthrough
CT: control target
= control target key end

     0   :  { %v192_v1 = vmov 0.0   ;;  %vm193_vm0 = vmmov 0   ;;  %s264_s0 = inlined_call_operand.vmem [shape: f32[8,128], index: 0, kind: input, shape index: {}]   ;;  %s265_s1 = inlined_call_operand.vmem [shape: f32[128,16], index: 1, kind: input, shape index: {}]   ;;  %s266_s2 = inlined_call_operand.hbm [shape: f32[8,16], index: 2, kind: output, shape index: {}]  }
   0x1   :  { %v28_v0 = vld [vmem:[%s265_s1 + $0x78] sm:$0xff]  ;;  %132 = vmatprep.subr.mxu0 %v192_v1  ;;  %v27_v2 = vld [vmem:[%s265_s1 + $0x70] sm:$0xff]  ;;  %164 = vmatprep.mubr.msk.f32.mxu0 %vm193_vm0, %v192_v1  ;;  %v26_v3 = vld [vmem:[%s265_s1 + $0x68] sm:$0xff] }
   0x2   :  { %133 = vmatpush3.msra.mxu0 %v28_v0  ;;  %v25_v4 = vld [vmem:[%s265_s1 + $0x60] sm:$0xff] }
   0x3   :  { %134 = vmatprep.subr.mxu0 %v192_v1 }
   0x4   :  { %135 = vmatpush3.msra.mxu0 %v27_v2 }
   0x5   :  { %136 = vmatprep.subr.mxu0 %v192_v1 }
   0x6   :  { %7 = vsyncpa [#allocation3], 0  ;;  %137 = vmatpush3.msra.mxu0 %v26_v3  ;;  %v24_v5 = vld [vmem:[%s265_s1 + $0x58] sm:$0xff]  ;;  %v23_v6 = vld [vmem:[%s265_s1 + $0x50] sm:$0xff]  ;;  %s194_s15 = smov [#allocation2]   ;;  %vm99_vm1 = vcmask 130048  }
   0x7   :  { %138 = vmatprep.subr.mxu0 %v192_v1  ;;  %v22_v7 = vld [vmem:[%s265_s1 + $0x48] sm:$0xff]  ;;  %v21_v8 = vld [vmem:[%s265_s1 + $0x40] sm:$0xff]  ;;  %v20_v9 = vld [vmem:[%s265_s1 + $0x38] sm:$0xff]  ;;  %s107_s16 = sshll.u32 %s194_s15, 4  ;;  %s108_s16 = int_to_ptr.vmem [resolvable:$true] %s107_s16 }
   0x8   :  { %139 = vmatpush3.msra.mxu0 %v25_v4  ;;  %v19_v10 = vld [vmem:[%s265_s1 + $0x30] sm:$0xff]  ;;  %v18_v11 = vld [vmem:[%s265_s1 + $0x28] sm:$0xff]  ;;  %v17_v12 = vld [vmem:[%s265_s1 + $0x20] sm:$0xff]  ;;  %s170_s17 = scalar_lea.vmem %s108_s16, 128  ;;  %p175_p1 = scmp.lt.s32.totalorder %s108_s16, %s108_s16 }
   0x9   :  { %140 = vmatprep.subr.mxu0 %v192_v1  ;;  %v16_v13 = vld [vmem:[%s265_s1 + $0x18] sm:$0xff]  ;;  %v15_v14 = vld [vmem:[%s265_s1 + $0x10] sm:$0xff]  ;;  %v14_v15 = vld [vmem:[%s265_s1 + $0x8] sm:$0xff]  ;;  %p171_p0 = scmp.ne.s32.totalorder %s108_s16, %s170_s17  ;;  %p176_p2 = scmp.lt.s32.totalorder %s170_s17, %s170_s17 }
   0xa   :  { %141 = vmatpush3.msra.mxu0 %v24_v5  ;;  %v13_v16 = vld [vmem:[%s265_s1] sm:$0xff] }
   0xb   :  { %142 = vmatprep.subr.mxu0 %v192_v1  ;;  %v12_v17 = vld [vmem:[%s264_s0] sm:$0xff]  ;;  %p177_p3 = por %p176_p2, %p175_p1 }
   0xc   :  { %143 = vmatpush3.msra.mxu0 %v23_v6 }
   0xd   :  { %144 = vmatprep.subr.mxu0 %v192_v1  ;;  %p178_p4 = pnand %p177_p3, %p171_p0 }
   0xe   :  { %145 = vmatpush3.msra.mxu0 %v22_v7 }
   0xf   :  { %146 = vmatprep.subr.mxu0 %v192_v1 }
  0x10   :  { %147 = vmatpush3.msra.mxu0 %v21_v8 }
  0x11   :  { %148 = vmatprep.subr.mxu0 %v192_v1 }
  0x12   :  { %149 = vmatpush3.msra.mxu0 %v20_v9 }
  0x13   :  { %150 = vmatprep.subr.mxu0 %v192_v1 }
  0x14   :  { %151 = vmatpush3.msra.mxu0 %v19_v10 }
  0x15   :  { %152 = vmatprep.subr.mxu0 %v192_v1 }
  0x16   :  { %153 = vmatpush3.msra.mxu0 %v18_v11 }
  0x17   :  { %154 = vmatprep.subr.mxu0 %v192_v1 }
  0x18   :  { %155 = vmatpush3.msra.mxu0 %v17_v12 }
  0x19   :  { %156 = vmatprep.subr.mxu0 %v192_v1 }
  0x1a   :  { %157 = vmatpush3.msra.mxu0 %v16_v13 }
  0x1b   :  { %158 = vmatprep.subr.mxu0 %v192_v1 }
  0x1c   :  { %159 = vmatpush3.msra.mxu0 %v15_v14 }
  0x1d   :  { %160 = vmatprep.subr.mxu0 %v192_v1 }
  0x1e   :  { %161 = vmatpush3.msra.mxu0 %v14_v15 }
  0x1f   :  { %162 = vmatprep.subr.mxu0 %v192_v1 }
  0x20   :  { %163 = vmatpush3.msra.mxu0 %v13_v16 }
  0x21   :  { %165 = vmatmul.mubr.f32.vlgmr.msra.gmra.mxu0 %v12_v17 }
  0xe1   :  { %v95_v18 = vpop.f32.mrf.mxu0 }
  0xe2   :  { %100 = vst.msk [vmem:[#allocation2] sm:$0xff] %vm99_vm1, %v95_v18 }
  0xe3   :  { %v166_v19 = vpop.f32.mrf.mxu0 }
  0xe4   :  { %181 = shalt.err (!%p178_p4)
}
  0xe5   :  { %110 = dma.vmem_to_hbm [thread:$0]  %s108_s16, 128, %s266_s2, [#allocation3]  }
  0xe6   :  { %190 = dma.done.wait [#allocation3], 128  }
  0xe7   :  { %191 = vsyncadd [#allocation3], 4294967168 }
  0xe8   :  { %114 = vsyncpa [#allocation3], 1 }

</bundles_post_ra>
